<compile_context>
chip_gen: v5e
topology: v5e:2x2
jax: 0.10.0
libtpu: 0.0.40
codegen_flags: <defaults>
</compile_context>

<pallas_src>
import random

import numpy as np
import jax
import jax.numpy as jnp
from jax.experimental import pallas as pl
from jax.experimental.pallas import tpu as pltpu


_LANE = 128
_SUBLANE = 8
_MAX_TILE_N = 4096        # power of two -> divides any larger power-of-two bucket
_MIN_BUCKET_N = 64
_MIN_BUCKET_E = 128


def _round_up(v, m):
    return ((v + m - 1) // m) * m


def _next_pow2(v):
    v = max(int(v), 1)
    return 1 << (v - 1).bit_length()


def _floor_pow2(v):
    v = max(int(v), 1)
    return 1 << (v.bit_length() - 1)


def _vmem_capacity_bytes():
    try:
        info = pltpu.get_tpu_info()
        return int(getattr(info, "vmem_capacity_bytes", 64 * 1024 * 1024))
    except Exception:
        return 64 * 1024 * 1024     # conservative fallback: v7x physical VMEM / TC


def _node_tile_and_vmem(n_b, c_in, c_out):
    """Pick the node tile (power of two, divides the bucket) and a VMEM limit
    sized from the real double-buffered footprint + headroom."""
    lane_cols = max(_round_up(max(c_in, c_out), _LANE), _LANE)
    # per node row: double-buffered x tile + h0 tile, one in-kernel h0 temp,
    # plus the (1, tile) score row padded to 8 sublanes; all f32.
    per_row = (2 * 2 + 1) * lane_cols * 4 + 2 * _SUBLANE * 4
    budget = _vmem_capacity_bytes() // 4          # 16 MiB on v7x, 32 MiB on v5e/v6e
    tile = _floor_pow2(max(budget // per_row, _MIN_BUCKET_N))
    tile = min(tile, _MAX_TILE_N, n_b)
    tiles_bytes = ((2 * 2 + 1) * tile * lane_cols
                   + 2 * _SUBLANE * max(tile, _LANE)) * 4
    resident = 4 * _SUBLANE * lane_cols * 4       # W_t + bias/score rows (padded)
    limit = tiles_bytes + resident + (4 << 20)    # compiler-scratch headroom
    return tile, int(min(max(limit, 16 << 20), 32 << 20))


# ----------------------------------------------------------------------------
# Pallas kernel: node transform + per-node score contribution (single launch)
# ----------------------------------------------------------------------------
def _node_kernel(x_ref, wt_ref, bth_ref, ws_ref, h0_ref, g_ref):
    # h0p = x @ W_t + 0.5*b_t  (half-bias folded in; the per-edge sum of two
    # h0p rows restores the full b_t, and 2*h0p is the self-merge transform).
    h0 = jnp.dot(x_ref[...], wt_ref[...], preferred_element_type=jnp.float32)
    h0 = h0 + bth_ref[...]
    h0_ref[...] = h0
    # Per-node raw-score contribution, lane-dense (1, tile) row on the MXU:
    #   g = h0p @ w_s ;  raw edge score = g[src] + g[dst] + b_s
    g_ref[...] = jax.lax.dot_general(
        ws_ref[...], h0, (((1,), (1,)), ((), ())),
        preferred_element_type=jnp.float32)


# ----------------------------------------------------------------------------
# Jitted hot path: Pallas node kernel + XLA-fused edge gather/score stage
# ----------------------------------------------------------------------------
@jax.jit
def _hot_path(x_p, ei_p, w_t, bt_half, ws_row, b_s):
    n_b, c_in = x_p.shape
    c_out = w_t.shape[1]
    tile_n, vmem_limit = _node_tile_and_vmem(n_b, c_in, c_out)

    h0p, g_row = pl.pallas_call(
        _node_kernel,
        out_shape=(jax.ShapeDtypeStruct((n_b, c_out), jnp.float32),
                   jax.ShapeDtypeStruct((1, n_b), jnp.float32)),
        grid_spec=pltpu.PrefetchScalarGridSpec(
            num_scalar_prefetch=0,
            grid=(n_b // tile_n,),
            in_specs=[
                pl.BlockSpec((tile_n, c_in), lambda i: (i, 0)),
                pl.BlockSpec((c_in, c_out), lambda i: (0, 0)),   # W_t resident
                pl.BlockSpec((1, c_out), lambda i: (0, 0)),      # 0.5*b_t resident
                pl.BlockSpec((1, c_out), lambda i: (0, 0)),      # w_s resident
            ],
            out_specs=(
                pl.BlockSpec((tile_n, c_out), lambda i: (i, 0)),
                pl.BlockSpec((1, tile_n), lambda i: (0, i)),     # lane-dense scores
            ),
        ),
        compiler_params=pltpu.CompilerParams(
            # TODO(synk): pltpu.CORE_PARALLEL would split this axis across the
            # two v7x TensorCores; "parallel" kept for portability.
            dimension_semantics=("parallel",),
            vmem_limit_bytes=vmem_limit),
    )(x_p, w_t, bt_half, ws_row)

    # Edge stage in XLA (one gather fusion). pallas_call is a fusion barrier,
    # so doing the gather here avoids writing + re-reading an [E, C_out]
    # `merged` intermediate through HBM; the only E-sized writeback left is the
    # x_merged output the module must return anyway.
    src = ei_p[0]
    dst = ei_p[1]
    x_merged = h0p[src] + h0p[dst]                   # == (x[src]+x[dst]) @ W_t + b_t
    g = g_row[0]
    edge_scores = jax.nn.sigmoid(g[src] + g[dst] + b_s[0])
    x_merged_self = 2.0 * h0p                        # == 2*x @ W_t + b_t
    return x_merged, edge_scores, x_merged_self


def edgepool_hot_path(x, edge_index, w_t, b_t, w_s, b_s):
    """x: [N, C_in] f32; edge_index: [2, E] int.
    Returns (x_merged [E, C_out], edge_scores [E], x_merged_self [N, C_out])."""
    N = x.shape[0]
    E = edge_index.shape[1]

    # Power-of-two shape buckets: padding happens OUTSIDE the jit, so the jit
    # only ever sees bucket shapes -> no per-graph-size recompilation.
    n_b = max(_MIN_BUCKET_N, _next_pow2(N))
    e_b = max(_MIN_BUCKET_E, _next_pow2(E))

    x_p = jnp.pad(jnp.asarray(x, jnp.float32), ((0, n_b - N), (0, 0)))
    ei = jnp.asarray(edge_index, dtype=jnp.int32)
    ei_p = jnp.pad(ei, ((0, 0), (0, e_b - E)))   # padded edges hit node 0 (valid row)

    w_t = jnp.asarray(w_t, jnp.float32)
    bt_half = 0.5 * jnp.asarray(b_t, jnp.float32).reshape(1, -1)
    ws_row = jnp.asarray(w_s, jnp.float32).reshape(1, -1)
    b_s = jnp.asarray(b_s, jnp.float32).reshape(-1)

    xm_p, e_p, xms_p = _hot_path(x_p, ei_p, w_t, bt_half, ws_row, b_s)
    # Slice the padded rows off so no phantom edges/nodes leak to the host loop.
    return xm_p[:E], e_p[:E], xms_p[:N]


# ----------------------------------------------------------------------------
# Host-side greedy edge contraction (sequential, data-dependent control flow).
# TODO(synk): __merge_edges__ is an inherently sequential greedy loop with
# random acceptance — no clean Pallas equivalent, kept as host NumPy glue.
# ----------------------------------------------------------------------------
def merge_edges(x, edge_index, batch, edge_score, x_merged, x_merged_self, rng):
    N = x.shape[0]
    nodes_remaining = set(range(N))
    cluster = np.empty(N, dtype=np.int64)
    edge_argsort = np.argsort(-edge_score, kind="stable")

    i = 0
    new_edge_indices = []
    emb_cat = []
    for edge_idx in edge_argsort.tolist():
        source = int(edge_index[0, edge_idx])
        r = rng.random()
        if r > edge_score[edge_idx]:
            continue
        if source not in nodes_remaining:
            continue
        target = int(edge_index[1, edge_idx])
        if target not in nodes_remaining:
            continue
        emb_cat.append(x_merged[edge_idx])
        new_edge_indices.append(edge_idx)
        cluster[source] = i
        nodes_remaining.remove(source)
        if source != target:
            cluster[target] = i
            nodes_remaining.remove(target)
        i += 1

    for node_idx in sorted(nodes_remaining):
        cluster[node_idx] = i
        emb_cat.append(x_merged_self[node_idx])
        i += 1

    new_x = np.vstack(emb_cat)
    new_edge_score = edge_score[new_edge_indices] if new_edge_indices else \
        np.zeros((0,), dtype=edge_score.dtype)
    if len(nodes_remaining) > 0:
        remaining_score = np.ones((new_x.shape[0] - len(new_edge_indices),),
                                  dtype=new_x.dtype)
        new_edge_score = np.concatenate([new_edge_score, remaining_score])

    # coalesce + remove_self_loops on the coarsened edge index
    ne = cluster[np.asarray(edge_index)]
    ne = ne[:, ne[0] != ne[1]]
    if ne.shape[1] > 0:
        new_edge_index = np.unique(ne.T, axis=0).T
    else:
        new_edge_index = np.zeros((2, 0), dtype=np.int64)

    new_batch = np.empty(new_x.shape[0], dtype=np.int64)
    new_batch[cluster] = np.asarray(batch)

    unpool_info = {
        "edge_index": np.asarray(edge_index),
        "cluster": cluster,
        "batch": np.asarray(batch),
        "new_edge_score": new_edge_score,
        "old_edge_score": edge_score,
    }
    return new_x, new_edge_index, new_batch, unpool_info


# ----------------------------------------------------------------------------
# Full EdgePooling.forward equivalent (merge_method='sum', score='sigmoid',
# dropout=0, add_to_edge_score=0.0 — the module defaults).
# ----------------------------------------------------------------------------
def edge_pooling_forward(x, edge_index, batch, params, rng):
    x_merged, e, x_merged_self = edgepool_hot_path(
        x, edge_index, params["w_t"], params["b_t"], params["w_s"], params["b_s"])
    jax.block_until_ready((x_merged, e, x_merged_self))

    # TODO(synk): for very large graphs, transfer only edge_scores first, run
    # the greedy selection, then gather just the accepted x_merged rows and the
    # remaining-node 2*h0p rows on device to shrink the host copy.
    x_np = np.asarray(x)
    e_np = np.asarray(e)
    xm_np = np.asarray(x_merged)
    xms_np = np.asarray(x_merged_self)

    x_new, e_ind_new, batch_new, unpool = merge_edges(
        x_np, np.asarray(edge_index), np.asarray(batch), e_np, xm_np, xms_np, rng)

    return {
        "new_graph": {"x_new": x_new, "e_ind_new": e_ind_new,
                      "batch_new": batch_new, "unpool": unpool},
        "internals": {"x_merged": xm_np, "x_merged_self": xms_np,
                      "edge_scores": e_np},
    }


if __name__ == "__main__":
    in_channels, out_channels = 8, 16
    N, E = 16, 24  # two graphs of 8 nodes, 12 edges each

    key = jax.random.PRNGKey(0)
    kx, ksrc0, kdst0, ksrc1, kdst1, kwt, kbt, kws, kbs = jax.random.split(key, 9)

    # node features + batch vector (two graphs)
    x = jax.random.normal(kx, (N, in_channels), dtype=jnp.float32)
    batch = jnp.concatenate([jnp.zeros(8, jnp.int32), jnp.ones(8, jnp.int32)])

    # random edges constrained to each graph
    s0 = jax.random.randint(ksrc0, (E // 2,), 0, 8)
    d0 = jax.random.randint(kdst0, (E // 2,), 0, 8)
    s1 = jax.random.randint(ksrc1, (E // 2,), 8, 16)
    d1 = jax.random.randint(kdst1, (E // 2,), 8, 16)
    edge_index = jnp.stack([jnp.concatenate([s0, s1]),
                            jnp.concatenate([d0, d1])]).astype(jnp.int32)

    # deterministic parameter init (PyTorch Linear-style uniform bounds)
    bound_t = 1.0 / np.sqrt(in_channels)
    bound_s = 1.0 / np.sqrt(out_channels)
    params = {
        # transform: Linear(in_channels, out_channels), stored transposed [C_in, C_out]
        "w_t": jax.random.uniform(kwt, (in_channels, out_channels),
                                  minval=-bound_t, maxval=bound_t, dtype=jnp.float32),
        "b_t": jax.random.uniform(kbt, (out_channels,),
                                  minval=-bound_t, maxval=bound_t, dtype=jnp.float32),
        # score_net: Linear(out_channels, 1), stored as [C_out]
        "w_s": jax.random.uniform(kws, (out_channels,),
                                  minval=-bound_s, maxval=bound_s, dtype=jnp.float32),
        "b_s": jax.random.uniform(kbs, (1,),
                                  minval=-bound_s, maxval=bound_s, dtype=jnp.float32),
    }

    rng = random.Random(0)
    out = edge_pooling_forward(x, edge_index, batch, params, rng)

    # numerical check against a plain-JAX reference of the module's math
    ref_xm = (x[edge_index[0]] + x[edge_index[1]]) @ params["w_t"] + params["b_t"]
    ref_xms = (2.0 * x) @ params["w_t"] + params["b_t"]
    ref_e = jax.nn.sigmoid(ref_xm @ params["w_s"] + params["b_s"][0])
    np.testing.assert_allclose(out["internals"]["x_merged"],
                               np.asarray(ref_xm), atol=1e-4, rtol=1e-4)
    np.testing.assert_allclose(out["internals"]["x_merged_self"],
                               np.asarray(ref_xms), atol=1e-4, rtol=1e-4)
    np.testing.assert_allclose(out["internals"]["edge_scores"],
                               np.asarray(ref_e), atol=1e-4, rtol=1e-4)

    # sanity checks
    assert out["internals"]["x_merged"].shape == (E, out_channels)
    assert out["internals"]["x_merged_self"].shape == (N, out_channels)
    assert out["internals"]["edge_scores"].shape == (E,)
    assert out["new_graph"]["x_new"].shape[1] == out_channels
    assert out["new_graph"]["batch_new"].shape[0] == out["new_graph"]["x_new"].shape[0]

    print("KERNEL_OK")
</pallas_src>

<mosaic_0001>
module attributes {stable_mosaic.version = 11 : i64} {
  func.func @_node_kernel(%arg0: i32, %arg1: memref<64x8xf32, #tpu.memory_space<vmem>>, %arg2: memref<8x16xf32, #tpu.memory_space<vmem>>, %arg3: memref<1x16xf32, #tpu.memory_space<vmem>>, %arg4: memref<1x16xf32, #tpu.memory_space<vmem>>, %arg5: memref<64x16xf32, #tpu.memory_space<vmem>>, %arg6: memref<1x64xf32, #tpu.memory_space<vmem>>) attributes {dimension_semantics = [#tpu.dimension_semantics<parallel>], iteration_bounds = array<i64: 1>, scalar_prefetch = 0 : i64, scratch_operands = 0 : i64, tpu.core_type = #tpu.core_type<tc>, window_params = [{transform_indices = @transform_0, window_bounds = array<i64: 64, 8>}, {pipeline_mode = #tpu.pipeline_mode<synchronous>, transform_indices = @transform_1, window_bounds = array<i64: 8, 16>}, {pipeline_mode = #tpu.pipeline_mode<synchronous>, transform_indices = @transform_2, window_bounds = array<i64: 1, 16>}, {pipeline_mode = #tpu.pipeline_mode<synchronous>, transform_indices = @transform_3, window_bounds = array<i64: 1, 16>}, {transform_indices = @transform_4, window_bounds = array<i64: 64, 16>}, {transform_indices = @transform_5, window_bounds = array<i64: 1, 64>}]} {
    %c0 = arith.constant 0 : index
    %c0_0 = arith.constant 0 : index
    %0 = vector.load %arg1[%c0, %c0_0] : memref<64x8xf32, #tpu.memory_space<vmem>>, vector<64x8xf32>
    %c0_1 = arith.constant 0 : index
    %c0_2 = arith.constant 0 : index
    %1 = vector.load %arg2[%c0_1, %c0_2] : memref<8x16xf32, #tpu.memory_space<vmem>>, vector<8x16xf32>
    %cst = arith.constant dense<0.000000e+00> : vector<64x16xf32>
    %2 = tpu.matmul %0, %1, %cst {dimension_numbers = #tpu.dot_dimension_numbers<[1], [0], [0], [1], [0, 0, 1, 1], [], []>} : vector<64x8xf32>, vector<8x16xf32>, vector<64x16xf32> -> vector<64x16xf32>
    %c0_3 = arith.constant 0 : index
    %c0_4 = arith.constant 0 : index
    %3 = vector.load %arg3[%c0_3, %c0_4] : memref<1x16xf32, #tpu.memory_space<vmem>>, vector<1x16xf32>
    %4 = vector.broadcast %3 : vector<1x16xf32> to vector<64x16xf32>
    %5 = arith.addf %2, %4 : vector<64x16xf32>
    %c0_5 = arith.constant 0 : index
    %c0_6 = arith.constant 0 : index
    %6 = vector.load %arg5[%c0_5, %c0_6] : memref<64x16xf32, #tpu.memory_space<vmem>>, vector<64x16xf32>
    tpu.vector_store %arg5[%c0_5, %c0_6], %5 {strides = array<i32>} : memref<64x16xf32, #tpu.memory_space<vmem>>, vector<64x16xf32>,
    %c0_7 = arith.constant 0 : index
    %c0_8 = arith.constant 0 : index
    %7 = vector.load %arg4[%c0_7, %c0_8] : memref<1x16xf32, #tpu.memory_space<vmem>>, vector<1x16xf32>
    %cst_9 = arith.constant dense<0.000000e+00> : vector<1x64xf32>
    %8 = tpu.matmul %7, %5, %cst_9 {dimension_numbers = #tpu.dot_dimension_numbers<[1], [1], [0], [0], [0, 0, 1, 0], [], []>} : vector<1x16xf32>, vector<64x16xf32>, vector<1x64xf32> -> vector<1x64xf32>
    %c0_10 = arith.constant 0 : index
    %c0_11 = arith.constant 0 : index
    %9 = vector.load %arg6[%c0_10, %c0_11] : memref<1x64xf32, #tpu.memory_space<vmem>>, vector<1x64xf32>
    tpu.vector_store %arg6[%c0_10, %c0_11], %8 {strides = array<i32>} : memref<1x64xf32, #tpu.memory_space<vmem>>, vector<1x64xf32>,
    return
  }
  func.func @transform_0(%arg0: i32) -> (i32, i32) {
    %c0_i32 = arith.constant 0 : i32
    %c0_i32_0 = arith.constant 0 : i32
    return %arg0, %c0_i32 : i32, i32
  }
  func.func @transform_1(%arg0: i32) -> (i32, i32) {
    %c0_i32 = arith.constant 0 : i32
    %c0_i32_0 = arith.constant 0 : i32
    %c0_i32_1 = arith.constant 0 : i32
    return %c0_i32, %c0_i32_0 : i32, i32
  }
  func.func @transform_2(%arg0: i32) -> (i32, i32) {
    %c0_i32 = arith.constant 0 : i32
    %c0_i32_0 = arith.constant 0 : i32
    %c0_i32_1 = arith.constant 0 : i32
    return %c0_i32, %c0_i32_0 : i32, i32
  }
  func.func @transform_3(%arg0: i32) -> (i32, i32) {
    %c0_i32 = arith.constant 0 : i32
    %c0_i32_0 = arith.constant 0 : i32
    %c0_i32_1 = arith.constant 0 : i32
    return %c0_i32, %c0_i32_0 : i32, i32
  }
  func.func @transform_4(%arg0: i32) -> (i32, i32) {
    %c0_i32 = arith.constant 0 : i32
    %c0_i32_0 = arith.constant 0 : i32
    return %arg0, %c0_i32 : i32, i32
  }
  func.func @transform_5(%arg0: i32) -> (i32, i32) {
    %c0_i32 = arith.constant 0 : i32
    %c0_i32_0 = arith.constant 0 : i32
    return %c0_i32, %arg0 : i32, i32
  }
}

</mosaic_0001>

<bundles_post_ra>
// kernel: _hot_path.1
= control target key start
LH: loop header
LB: loop body
LE: loop exit
PB: predicated region body
PF: predicated region fallthrough
CT: control target
= control target key end

     0   :  { %vm32_vm0 = vcmask 64512   ;;  %vm98_vm1 = vcmask 130048   ;;  %vm155_vm2 = vcmask 516096   ;;  %s299_s1 = inlined_call_operand.vmem [shape: f32[8,16], index: 1, kind: input, shape index: {}]   ;;  %s300_s0 = inlined_call_operand.vmem [shape: f32[64,8], index: 0, kind: input, shape index: {}]   ;;  %s301_s2 = inlined_call_operand.vmem [shape: f32[1,16], index: 2, kind: input, shape index: {}]   ;;  %s302_s4 = inlined_call_operand.vmem [shape: f32[64,16], index: 4, kind: output, shape index: {0}]   ;;  %s303_s3 = inlined_call_operand.vmem [shape: f32[1,16], index: 3, kind: input, shape index: {}]   ;;  %s304_s5 = inlined_call_operand.vmem [shape: f32[1,64], index: 5, kind: output, shape index: {1}]  }
   0x1   :  { %v27_v0 = vld [vmem:[%s299_s1] sm:$0xff]  ;;  %v24_v3 = vld [vmem:[%s300_s0 + $0x28] sm:$0xff]  ;;  %v25_v5 = vld [vmem:[%s300_s0 + $0x30] sm:$0xff] }
   0x2   :  { %v23_v1 = vld [vmem:[%s300_s0 + $0x20] sm:$0xff]  ;;  %182 = vmatpush.msra.mxu2 %v27_v0  ;;  %72 = vmatpush.msra.mxu0 %v27_v0  ;;  %v20_v4 = vld [vmem:[%s300_s0 + $0x8] sm:$0xff]  ;;  %v21_v6 = vld [vmem:[%s300_s0 + $0x10] sm:$0xff] }
   0x3   :  { %v19_v2 = vld [vmem:[%s300_s0] sm:$0xff]  ;;  %169 = vmatmul.msk.f32.vlgmr.msra.gmra.mxu2 %vm32_vm0, %v23_v1  ;;  %v26_v7 = vld [vmem:[%s300_s0 + $0x38] sm:$0xff] }
   0x4   :  { %165 = vmatmul.msk.f32.vlgmr.msra.gmra.mxu0 %vm32_vm0, %v19_v2  ;;  %v22_v8 = vld [vmem:[%s300_s0 + $0x18] sm:$0xff]  ;;  %v183_v9 = vld [vmem:[%s301_s2] ss:$0 sm:$0xff] }
   0x5   :  { %v107_v26 = vld [vmem:[%s303_s3] sm:$0x1] }
   0xb   :  { %170 = vmatmul.msk.f32.gmra.mxu2 %vm32_vm0, %v24_v3 }
   0xc   :  { %166 = vmatmul.msk.f32.gmra.mxu0 %vm32_vm0, %v20_v4 }
  0x13   :  { %171 = vmatmul.msk.f32.gmra.mxu2 %vm32_vm0, %v25_v5 }
  0x14   :  { %167 = vmatmul.msk.f32.gmra.mxu0 %vm32_vm0, %v21_v6 }
  0x1b   :  { %172 = vmatmul.msk.f32.gmra.mxu2 %vm32_vm0, %v26_v7 }
  0x1c   :  { %168 = vmatmul.msk.f32.gmra.mxu0 %vm32_vm0, %v22_v8 }
  0x81   :  { %v74_v10 = vpop.f32.mrf.mxu0 }
  0x82   :  { %v75_v11 = vadd.f32 %v183_v9, %v74_v10 }
  0x84   :  { %99 = vst.msk [vmem:[%s302_s4] sm:$0xff] %vm98_vm1, %v75_v11 }
  0x86   :  { %v86_v12 = vpop.f32.mrf.mxu2 }
  0x87   :  { %v87_v13 = vadd.f32 %v183_v9, %v86_v12 }
  0x89   :  { %v77_v14 = vpop.f32.mrf.mxu0  ;;  %103 = vst.msk [vmem:[%s302_s4 + $0x20] sm:$0xff] %vm98_vm1, %v87_v13 }
  0x8a   :  { %v78_v15 = vadd.f32 %v183_v9, %v77_v14 }
  0x8c   :  { %100 = vst.msk [vmem:[%s302_s4 + $0x8] sm:$0xff] %vm98_vm1, %v78_v15 }
  0x8e   :  { %v89_v16 = vpop.f32.mrf.mxu2 }
  0x8f   :  { %v90_v17 = vadd.f32 %v183_v9, %v89_v16 }
  0x91   :  { %v80_v18 = vpop.f32.mrf.mxu0  ;;  %104 = vst.msk [vmem:[%s302_s4 + $0x28] sm:$0xff] %vm98_vm1, %v90_v17 }
  0x92   :  { %v81_v19 = vadd.f32 %v183_v9, %v80_v18 }
  0x94   :  { %101 = vst.msk [vmem:[%s302_s4 + $0x10] sm:$0xff] %vm98_vm1, %v81_v19 }
  0x96   :  { %v92_v20 = vpop.f32.mrf.mxu2 }
  0x97   :  { %v93_v21 = vadd.f32 %v183_v9, %v92_v20 }
  0x99   :  { %v83_v22 = vpop.f32.mrf.mxu0  ;;  %105 = vst.msk [vmem:[%s302_s4 + $0x30] sm:$0xff] %vm98_vm1, %v93_v21 }
  0x9a   :  { %v84_v23 = vadd.f32 %v183_v9, %v83_v22 }
  0x9c   :  { %102 = vst.msk [vmem:[%s302_s4 + $0x18] sm:$0xff] %vm98_vm1, %v84_v23 }
  0x9e   :  { %v95_v24 = vpop.f32.mrf.mxu2 }
  0x9f   :  { %v96_v25 = vadd.f32 %v183_v9, %v95_v24 }
  0xa1   :  { %106 = vst.msk [vmem:[%s302_s4 + $0x38] sm:$0xff] %vm98_vm1, %v96_v25  ;;  %173 = vmatpush.xpose.msk.msra.mxu1 %vm98_vm1, %v96_v25 }
  0xa5   :  { %174 = vmatpush.xpose.msk.msra.mxu1 %vm98_vm1, %v93_v21 }
  0xa9   :  { %175 = vmatpush.xpose.msk.msra.mxu1 %vm98_vm1, %v90_v17 }
  0xad   :  { %176 = vmatpush.xpose.msk.msra.mxu1 %vm98_vm1, %v87_v13 }
  0xb1   :  { %177 = vmatpush.xpose.msk.msra.mxu1 %vm98_vm1, %v84_v23 }
  0xb5   :  { %178 = vmatpush.xpose.msk.msra.mxu1 %vm98_vm1, %v81_v19 }
  0xb9   :  { %179 = vmatpush.xpose.msk.msra.mxu1 %vm98_vm1, %v78_v15 }
  0xbd   :  { %180 = vmatpush.xpose.msk.msra.mxu1 %vm98_vm1, %v75_v11 }
  0xc0   :  { %181 = vmatmul.msk.f32.vlgmr.msra.gmra.mxu1 %vm98_vm1, %v107_v26 }
 0x13d   :  { %v152_v27 = vpop.f32.mrf.mxu1 }
 0x13e   :  { %156 = vst.msk [vmem:[%s304_s5] sm:$0x1] %vm155_vm2, %v152_v27 }

</bundles_post_ra>
